<compile_context>
chip_gen: v5e
topology: v5e:2x2
jax: 0.10.0
libtpu: 0.0.40
codegen_flags: <defaults>
</compile_context>

<pallas_src>
import math

import jax
import jax.numpy as jnp
from jax.experimental import pallas as pl
from jax.experimental.pallas import tpu as pltpu

HIDDEN = 14
LANES = 128


def mlp_kernel(w1_ref, b1_ref, w2_ref, b2_ref, x_ref, o_ref):
    # x_ref/o_ref: (block_rows, 128) f32 tiles of the lane-dense batch.
    # w1/b1/w2: (14,) f32 in SMEM; b2: (1,) f32 in SMEM.
    x = x_ref[...]
    acc = jnp.full(x.shape, b2_ref[0], dtype=jnp.float32)
    # Unrolled over hidden units: broadcast scalar MAC (VPU) + sigmoid (EUP).
    for j in range(HIDDEN):
        h = jax.nn.sigmoid(w1_ref[j] * x + b1_ref[j]) - 0.5
        acc = acc + w2_ref[j] * h
    o_ref[...] = (jax.nn.sigmoid(acc) - 0.5).astype(o_ref.dtype)


def net_forward(x, w1, b1, w2, b2, *, tile_rows=512):
    """Forward pass of Net.

    x:  (N, 1) float32 (same layout as the PyTorch module input).
    Params in PyTorch nn.Linear layout: w1 (14,1), b1 (14,), w2 (1,14), b2 (1,).
    """
    n = x.shape[0]
    rows = -(-n // LANES)  # ceil(N / 128): batch mapped onto the 128-lane axis
    if rows >= tile_rows:
        padded_rows = -(-rows // tile_rows) * tile_rows
        block_rows = tile_rows            # (512,128) f32 = 256 KiB per buffer
    else:
        padded_rows = rows
        block_rows = rows                 # single full-array block (tiny batch)
    total = padded_rows * LANES

    xf = jnp.pad(x.reshape(-1).astype(jnp.float32), (0, total - n))
    x2 = xf.reshape(padded_rows, LANES)   # lane-dense batch layout

    w1f = w1.reshape(HIDDEN).astype(jnp.float32)
    b1f = b1.reshape(HIDDEN).astype(jnp.float32)
    w2f = w2.reshape(HIDDEN).astype(jnp.float32)
    b2f = b2.reshape(1).astype(jnp.float32)

    smem = pl.BlockSpec(memory_space=pltpu.MemorySpace.SMEM)
    out2 = pl.pallas_call(
        mlp_kernel,
        out_shape=jax.ShapeDtypeStruct((padded_rows, LANES), jnp.float32),
        grid=(padded_rows // block_rows,),
        in_specs=[
            smem, smem, smem, smem,                                 # params
            pl.BlockSpec((block_rows, LANES), lambda i: (i, 0)),    # x tile
        ],
        out_specs=pl.BlockSpec((block_rows, LANES), lambda i: (i, 0)),
        compiler_params=pltpu.CompilerParams(
            dimension_semantics=("parallel",)),
    )(w1f, b1f, w2f, b2f, x2)

    # Strip padded elements back to the original (N, 1) shape.
    return out2.reshape(-1)[:n].reshape(n, 1)


def init_params(key):
    # Mimics nn.Linear's uniform(-1/sqrt(fan_in), 1/sqrt(fan_in)) init.
    k1, k2, k3, k4 = jax.random.split(key, 4)
    bound1 = 1.0                        # fc1: in_features = 1
    bound2 = 1.0 / math.sqrt(HIDDEN)    # fc2: in_features = 14
    w1 = jax.random.uniform(k1, (HIDDEN, 1), jnp.float32, -bound1, bound1)
    b1 = jax.random.uniform(k2, (HIDDEN,), jnp.float32, -bound1, bound1)
    w2 = jax.random.uniform(k3, (1, HIDDEN), jnp.float32, -bound2, bound2)
    b2 = jax.random.uniform(k4, (1,), jnp.float32, -bound2, bound2)
    return w1, b1, w2, b2


if __name__ == "__main__":
    key = jax.random.PRNGKey(0)
    kx, kp = jax.random.split(key)
    w1, b1, w2, b2 = init_params(kp)

    def net_ref(xx):
        h = jax.nn.sigmoid(xx @ w1.T + b1) - 0.5
        return jax.nn.sigmoid(h @ w2.T + b2) - 0.5

    # Small batch (matches the module's typical use) + a ragged batch that
    # exercises the 128-lane padding / stripping path.
    for n in (8, 300):
        x = jax.random.normal(jax.random.fold_in(kx, n), (n, 1), jnp.float32)
        out = net_forward(x, w1, b1, w2, b2)
        jax.block_until_ready(out)
        assert out.shape == (n, 1)
        assert jnp.allclose(out, net_ref(x), atol=1e-5, rtol=1e-5)

    print("KERNEL_OK")
</pallas_src>

<mosaic_0001>
module attributes {stable_mosaic.version = 11 : i64} {
  func.func @mlp_kernel(%arg0: i32, %arg1: memref<14xf32, #tpu.memory_space<smem>>, %arg2: memref<14xf32, #tpu.memory_space<smem>>, %arg3: memref<14xf32, #tpu.memory_space<smem>>, %arg4: memref<1xf32, #tpu.memory_space<smem>>, %arg5: memref<1x128xf32, #tpu.memory_space<vmem>>, %arg6: memref<1x128xf32, #tpu.memory_space<vmem>>) attributes {dimension_semantics = [#tpu.dimension_semantics<parallel>], iteration_bounds = array<i64: 1>, scalar_prefetch = 0 : i64, scratch_operands = 0 : i64, tpu.core_type = #tpu.core_type<tc>, window_params = [{transform_indices = @transform_0, window_bounds = array<i64: 14>}, {transform_indices = @transform_1, window_bounds = array<i64: 14>}, {transform_indices = @transform_2, window_bounds = array<i64: 14>}, {transform_indices = @transform_3, window_bounds = array<i64: 1>}, {transform_indices = @transform_4, window_bounds = array<i64: 1, 128>}, {transform_indices = @transform_5, window_bounds = array<i64: 1, 128>}]} {
    %c0 = arith.constant 0 : index
    %c0_0 = arith.constant 0 : index
    %0 = vector.load %arg5[%c0, %c0_0] : memref<1x128xf32, #tpu.memory_space<vmem>>, vector<1x128xf32>
    %c0_1 = arith.constant 0 : index
    %1 = memref.load %arg4[%c0_1] : memref<1xf32, #tpu.memory_space<smem>>
    %2 = vector.broadcast %1 : f32 to vector<1x128xf32>
    %c0_2 = arith.constant 0 : index
    %3 = memref.load %arg1[%c0_2] : memref<14xf32, #tpu.memory_space<smem>>
    %4 = vector.broadcast %3 : f32 to vector<1x128xf32>
    %5 = arith.mulf %4, %0 : vector<1x128xf32>
    %c0_3 = arith.constant 0 : index
    %6 = memref.load %arg2[%c0_3] : memref<14xf32, #tpu.memory_space<smem>>
    %7 = vector.broadcast %6 : f32 to vector<1x128xf32>
    %8 = arith.addf %5, %7 : vector<1x128xf32>
    %9 = arith.negf %8 : vector<1x128xf32>
    %10 = math.exp %9 : vector<1x128xf32>
    %cst = arith.constant 1.000000e+00 : f32
    %11 = vector.broadcast %cst : f32 to vector<1x128xf32>
    %12 = arith.addf %11, %10 : vector<1x128xf32>
    %13 = arith.divf %11, %12 : vector<1x128xf32>
    %cst_4 = arith.constant 5.000000e-01 : f32
    %14 = vector.broadcast %cst_4 : f32 to vector<1x128xf32>
    %15 = arith.subf %13, %14 : vector<1x128xf32>
    %c0_5 = arith.constant 0 : index
    %16 = memref.load %arg3[%c0_5] : memref<14xf32, #tpu.memory_space<smem>>
    %17 = vector.broadcast %16 : f32 to vector<1x128xf32>
    %18 = arith.mulf %17, %15 : vector<1x128xf32>
    %19 = arith.addf %2, %18 : vector<1x128xf32>
    %c1 = arith.constant 1 : index
    %20 = memref.load %arg1[%c1] : memref<14xf32, #tpu.memory_space<smem>>
    %21 = vector.broadcast %20 : f32 to vector<1x128xf32>
    %22 = arith.mulf %21, %0 : vector<1x128xf32>
    %c1_6 = arith.constant 1 : index
    %23 = memref.load %arg2[%c1_6] : memref<14xf32, #tpu.memory_space<smem>>
    %24 = vector.broadcast %23 : f32 to vector<1x128xf32>
    %25 = arith.addf %22, %24 : vector<1x128xf32>
    %26 = arith.negf %25 : vector<1x128xf32>
    %27 = math.exp %26 : vector<1x128xf32>
    %cst_7 = arith.constant 1.000000e+00 : f32
    %28 = vector.broadcast %cst_7 : f32 to vector<1x128xf32>
    %29 = arith.addf %28, %27 : vector<1x128xf32>
    %30 = arith.divf %28, %29 : vector<1x128xf32>
    %cst_8 = arith.constant 5.000000e-01 : f32
    %31 = vector.broadcast %cst_8 : f32 to vector<1x128xf32>
    %32 = arith.subf %30, %31 : vector<1x128xf32>
    %c1_9 = arith.constant 1 : index
    %33 = memref.load %arg3[%c1_9] : memref<14xf32, #tpu.memory_space<smem>>
    %34 = vector.broadcast %33 : f32 to vector<1x128xf32>
    %35 = arith.mulf %34, %32 : vector<1x128xf32>
    %36 = arith.addf %19, %35 : vector<1x128xf32>
    %c2 = arith.constant 2 : index
    %37 = memref.load %arg1[%c2] : memref<14xf32, #tpu.memory_space<smem>>
    %38 = vector.broadcast %37 : f32 to vector<1x128xf32>
    %39 = arith.mulf %38, %0 : vector<1x128xf32>
    %c2_10 = arith.constant 2 : index
    %40 = memref.load %arg2[%c2_10] : memref<14xf32, #tpu.memory_space<smem>>
    %41 = vector.broadcast %40 : f32 to vector<1x128xf32>
    %42 = arith.addf %39, %41 : vector<1x128xf32>
    %43 = arith.negf %42 : vector<1x128xf32>
    %44 = math.exp %43 : vector<1x128xf32>
    %cst_11 = arith.constant 1.000000e+00 : f32
    %45 = vector.broadcast %cst_11 : f32 to vector<1x128xf32>
    %46 = arith.addf %45, %44 : vector<1x128xf32>
    %47 = arith.divf %45, %46 : vector<1x128xf32>
    %cst_12 = arith.constant 5.000000e-01 : f32
    %48 = vector.broadcast %cst_12 : f32 to vector<1x128xf32>
    %49 = arith.subf %47, %48 : vector<1x128xf32>
    %c2_13 = arith.constant 2 : index
    %50 = memref.load %arg3[%c2_13] : memref<14xf32, #tpu.memory_space<smem>>
    %51 = vector.broadcast %50 : f32 to vector<1x128xf32>
    %52 = arith.mulf %51, %49 : vector<1x128xf32>
    %53 = arith.addf %36, %52 : vector<1x128xf32>
    %c3 = arith.constant 3 : index
    %54 = memref.load %arg1[%c3] : memref<14xf32, #tpu.memory_space<smem>>
    %55 = vector.broadcast %54 : f32 to vector<1x128xf32>
    %56 = arith.mulf %55, %0 : vector<1x128xf32>
    %c3_14 = arith.constant 3 : index
    %57 = memref.load %arg2[%c3_14] : memref<14xf32, #tpu.memory_space<smem>>
    %58 = vector.broadcast %57 : f32 to vector<1x128xf32>
    %59 = arith.addf %56, %58 : vector<1x128xf32>
    %60 = arith.negf %59 : vector<1x128xf32>
    %61 = math.exp %60 : vector<1x128xf32>
    %cst_15 = arith.constant 1.000000e+00 : f32
    %62 = vector.broadcast %cst_15 : f32 to vector<1x128xf32>
    %63 = arith.addf %62, %61 : vector<1x128xf32>
    %64 = arith.divf %62, %63 : vector<1x128xf32>
    %cst_16 = arith.constant 5.000000e-01 : f32
    %65 = vector.broadcast %cst_16 : f32 to vector<1x128xf32>
    %66 = arith.subf %64, %65 : vector<1x128xf32>
    %c3_17 = arith.constant 3 : index
    %67 = memref.load %arg3[%c3_17] : memref<14xf32, #tpu.memory_space<smem>>
    %68 = vector.broadcast %67 : f32 to vector<1x128xf32>
    %69 = arith.mulf %68, %66 : vector<1x128xf32>
    %70 = arith.addf %53, %69 : vector<1x128xf32>
    %c4 = arith.constant 4 : index
    %71 = memref.load %arg1[%c4] : memref<14xf32, #tpu.memory_space<smem>>
    %72 = vector.broadcast %71 : f32 to vector<1x128xf32>
    %73 = arith.mulf %72, %0 : vector<1x128xf32>
    %c4_18 = arith.constant 4 : index
    %74 = memref.load %arg2[%c4_18] : memref<14xf32, #tpu.memory_space<smem>>
    %75 = vector.broadcast %74 : f32 to vector<1x128xf32>
    %76 = arith.addf %73, %75 : vector<1x128xf32>
    %77 = arith.negf %76 : vector<1x128xf32>
    %78 = math.exp %77 : vector<1x128xf32>
    %cst_19 = arith.constant 1.000000e+00 : f32
    %79 = vector.broadcast %cst_19 : f32 to vector<1x128xf32>
    %80 = arith.addf %79, %78 : vector<1x128xf32>
    %81 = arith.divf %79, %80 : vector<1x128xf32>
    %cst_20 = arith.constant 5.000000e-01 : f32
    %82 = vector.broadcast %cst_20 : f32 to vector<1x128xf32>
    %83 = arith.subf %81, %82 : vector<1x128xf32>
    %c4_21 = arith.constant 4 : index
    %84 = memref.load %arg3[%c4_21] : memref<14xf32, #tpu.memory_space<smem>>
    %85 = vector.broadcast %84 : f32 to vector<1x128xf32>
    %86 = arith.mulf %85, %83 : vector<1x128xf32>
    %87 = arith.addf %70, %86 : vector<1x128xf32>
    %c5 = arith.constant 5 : index
    %88 = memref.load %arg1[%c5] : memref<14xf32, #tpu.memory_space<smem>>
    %89 = vector.broadcast %88 : f32 to vector<1x128xf32>
    %90 = arith.mulf %89, %0 : vector<1x128xf32>
    %c5_22 = arith.constant 5 : index
    %91 = memref.load %arg2[%c5_22] : memref<14xf32, #tpu.memory_space<smem>>
    %92 = vector.broadcast %91 : f32 to vector<1x128xf32>
    %93 = arith.addf %90, %92 : vector<1x128xf32>
    %94 = arith.negf %93 : vector<1x128xf32>
    %95 = math.exp %94 : vector<1x128xf32>
    %cst_23 = arith.constant 1.000000e+00 : f32
    %96 = vector.broadcast %cst_23 : f32 to vector<1x128xf32>
    %97 = arith.addf %96, %95 : vector<1x128xf32>
    %98 = arith.divf %96, %97 : vector<1x128xf32>
    %cst_24 = arith.constant 5.000000e-01 : f32
    %99 = vector.broadcast %cst_24 : f32 to vector<1x128xf32>
    %100 = arith.subf %98, %99 : vector<1x128xf32>
    %c5_25 = arith.constant 5 : index
    %101 = memref.load %arg3[%c5_25] : memref<14xf32, #tpu.memory_space<smem>>
    %102 = vector.broadcast %101 : f32 to vector<1x128xf32>
    %103 = arith.mulf %102, %100 : vector<1x128xf32>
    %104 = arith.addf %87, %103 : vector<1x128xf32>
    %c6 = arith.constant 6 : index
    %105 = memref.load %arg1[%c6] : memref<14xf32, #tpu.memory_space<smem>>
    %106 = vector.broadcast %105 : f32 to vector<1x128xf32>
    %107 = arith.mulf %106, %0 : vector<1x128xf32>
    %c6_26 = arith.constant 6 : index
    %108 = memref.load %arg2[%c6_26] : memref<14xf32, #tpu.memory_space<smem>>
    %109 = vector.broadcast %108 : f32 to vector<1x128xf32>
    %110 = arith.addf %107, %109 : vector<1x128xf32>
    %111 = arith.negf %110 : vector<1x128xf32>
    %112 = math.exp %111 : vector<1x128xf32>
    %cst_27 = arith.constant 1.000000e+00 : f32
    %113 = vector.broadcast %cst_27 : f32 to vector<1x128xf32>
    %114 = arith.addf %113, %112 : vector<1x128xf32>
    %115 = arith.divf %113, %114 : vector<1x128xf32>
    %cst_28 = arith.constant 5.000000e-01 : f32
    %116 = vector.broadcast %cst_28 : f32 to vector<1x128xf32>
    %117 = arith.subf %115, %116 : vector<1x128xf32>
    %c6_29 = arith.constant 6 : index
    %118 = memref.load %arg3[%c6_29] : memref<14xf32, #tpu.memory_space<smem>>
    %119 = vector.broadcast %118 : f32 to vector<1x128xf32>
    %120 = arith.mulf %119, %117 : vector<1x128xf32>
    %121 = arith.addf %104, %120 : vector<1x128xf32>
    %c7 = arith.constant 7 : index
    %122 = memref.load %arg1[%c7] : memref<14xf32, #tpu.memory_space<smem>>
    %123 = vector.broadcast %122 : f32 to vector<1x128xf32>
    %124 = arith.mulf %123, %0 : vector<1x128xf32>
    %c7_30 = arith.constant 7 : index
    %125 = memref.load %arg2[%c7_30] : memref<14xf32, #tpu.memory_space<smem>>
    %126 = vector.broadcast %125 : f32 to vector<1x128xf32>
    %127 = arith.addf %124, %126 : vector<1x128xf32>
    %128 = arith.negf %127 : vector<1x128xf32>
    %129 = math.exp %128 : vector<1x128xf32>
    %cst_31 = arith.constant 1.000000e+00 : f32
    %130 = vector.broadcast %cst_31 : f32 to vector<1x128xf32>
    %131 = arith.addf %130, %129 : vector<1x128xf32>
    %132 = arith.divf %130, %131 : vector<1x128xf32>
    %cst_32 = arith.constant 5.000000e-01 : f32
    %133 = vector.broadcast %cst_32 : f32 to vector<1x128xf32>
    %134 = arith.subf %132, %133 : vector<1x128xf32>
    %c7_33 = arith.constant 7 : index
    %135 = memref.load %arg3[%c7_33] : memref<14xf32, #tpu.memory_space<smem>>
    %136 = vector.broadcast %135 : f32 to vector<1x128xf32>
    %137 = arith.mulf %136, %134 : vector<1x128xf32>
    %138 = arith.addf %121, %137 : vector<1x128xf32>
    %c8 = arith.constant 8 : index
    %139 = memref.load %arg1[%c8] : memref<14xf32, #tpu.memory_space<smem>>
    %140 = vector.broadcast %139 : f32 to vector<1x128xf32>
    %141 = arith.mulf %140, %0 : vector<1x128xf32>
    %c8_34 = arith.constant 8 : index
    %142 = memref.load %arg2[%c8_34] : memref<14xf32, #tpu.memory_space<smem>>
    %143 = vector.broadcast %142 : f32 to vector<1x128xf32>
    %144 = arith.addf %141, %143 : vector<1x128xf32>
    %145 = arith.negf %144 : vector<1x128xf32>
    %146 = math.exp %145 : vector<1x128xf32>
    %cst_35 = arith.constant 1.000000e+00 : f32
    %147 = vector.broadcast %cst_35 : f32 to vector<1x128xf32>
    %148 = arith.addf %147, %146 : vector<1x128xf32>
    %149 = arith.divf %147, %148 : vector<1x128xf32>
    %cst_36 = arith.constant 5.000000e-01 : f32
    %150 = vector.broadcast %cst_36 : f32 to vector<1x128xf32>
    %151 = arith.subf %149, %150 : vector<1x128xf32>
    %c8_37 = arith.constant 8 : index
    %152 = memref.load %arg3[%c8_37] : memref<14xf32, #tpu.memory_space<smem>>
    %153 = vector.broadcast %152 : f32 to vector<1x128xf32>
    %154 = arith.mulf %153, %151 : vector<1x128xf32>
    %155 = arith.addf %138, %154 : vector<1x128xf32>
    %c9 = arith.constant 9 : index
    %156 = memref.load %arg1[%c9] : memref<14xf32, #tpu.memory_space<smem>>
    %157 = vector.broadcast %156 : f32 to vector<1x128xf32>
    %158 = arith.mulf %157, %0 : vector<1x128xf32>
    %c9_38 = arith.constant 9 : index
    %159 = memref.load %arg2[%c9_38] : memref<14xf32, #tpu.memory_space<smem>>
    %160 = vector.broadcast %159 : f32 to vector<1x128xf32>
    %161 = arith.addf %158, %160 : vector<1x128xf32>
    %162 = arith.negf %161 : vector<1x128xf32>
    %163 = math.exp %162 : vector<1x128xf32>
    %cst_39 = arith.constant 1.000000e+00 : f32
    %164 = vector.broadcast %cst_39 : f32 to vector<1x128xf32>
    %165 = arith.addf %164, %163 : vector<1x128xf32>
    %166 = arith.divf %164, %165 : vector<1x128xf32>
    %cst_40 = arith.constant 5.000000e-01 : f32
    %167 = vector.broadcast %cst_40 : f32 to vector<1x128xf32>
    %168 = arith.subf %166, %167 : vector<1x128xf32>
    %c9_41 = arith.constant 9 : index
    %169 = memref.load %arg3[%c9_41] : memref<14xf32, #tpu.memory_space<smem>>
    %170 = vector.broadcast %169 : f32 to vector<1x128xf32>
    %171 = arith.mulf %170, %168 : vector<1x128xf32>
    %172 = arith.addf %155, %171 : vector<1x128xf32>
    %c10 = arith.constant 10 : index
    %173 = memref.load %arg1[%c10] : memref<14xf32, #tpu.memory_space<smem>>
    %174 = vector.broadcast %173 : f32 to vector<1x128xf32>
    %175 = arith.mulf %174, %0 : vector<1x128xf32>
    %c10_42 = arith.constant 10 : index
    %176 = memref.load %arg2[%c10_42] : memref<14xf32, #tpu.memory_space<smem>>
    %177 = vector.broadcast %176 : f32 to vector<1x128xf32>
    %178 = arith.addf %175, %177 : vector<1x128xf32>
    %179 = arith.negf %178 : vector<1x128xf32>
    %180 = math.exp %179 : vector<1x128xf32>
    %cst_43 = arith.constant 1.000000e+00 : f32
    %181 = vector.broadcast %cst_43 : f32 to vector<1x128xf32>
    %182 = arith.addf %181, %180 : vector<1x128xf32>
    %183 = arith.divf %181, %182 : vector<1x128xf32>
    %cst_44 = arith.constant 5.000000e-01 : f32
    %184 = vector.broadcast %cst_44 : f32 to vector<1x128xf32>
    %185 = arith.subf %183, %184 : vector<1x128xf32>
    %c10_45 = arith.constant 10 : index
    %186 = memref.load %arg3[%c10_45] : memref<14xf32, #tpu.memory_space<smem>>
    %187 = vector.broadcast %186 : f32 to vector<1x128xf32>
    %188 = arith.mulf %187, %185 : vector<1x128xf32>
    %189 = arith.addf %172, %188 : vector<1x128xf32>
    %c11 = arith.constant 11 : index
    %190 = memref.load %arg1[%c11] : memref<14xf32, #tpu.memory_space<smem>>
    %191 = vector.broadcast %190 : f32 to vector<1x128xf32>
    %192 = arith.mulf %191, %0 : vector<1x128xf32>
    %c11_46 = arith.constant 11 : index
    %193 = memref.load %arg2[%c11_46] : memref<14xf32, #tpu.memory_space<smem>>
    %194 = vector.broadcast %193 : f32 to vector<1x128xf32>
    %195 = arith.addf %192, %194 : vector<1x128xf32>
    %196 = arith.negf %195 : vector<1x128xf32>
    %197 = math.exp %196 : vector<1x128xf32>
    %cst_47 = arith.constant 1.000000e+00 : f32
    %198 = vector.broadcast %cst_47 : f32 to vector<1x128xf32>
    %199 = arith.addf %198, %197 : vector<1x128xf32>
    %200 = arith.divf %198, %199 : vector<1x128xf32>
    %cst_48 = arith.constant 5.000000e-01 : f32
    %201 = vector.broadcast %cst_48 : f32 to vector<1x128xf32>
    %202 = arith.subf %200, %201 : vector<1x128xf32>
    %c11_49 = arith.constant 11 : index
    %203 = memref.load %arg3[%c11_49] : memref<14xf32, #tpu.memory_space<smem>>
    %204 = vector.broadcast %203 : f32 to vector<1x128xf32>
    %205 = arith.mulf %204, %202 : vector<1x128xf32>
    %206 = arith.addf %189, %205 : vector<1x128xf32>
    %c12 = arith.constant 12 : index
    %207 = memref.load %arg1[%c12] : memref<14xf32, #tpu.memory_space<smem>>
    %208 = vector.broadcast %207 : f32 to vector<1x128xf32>
    %209 = arith.mulf %208, %0 : vector<1x128xf32>
    %c12_50 = arith.constant 12 : index
    %210 = memref.load %arg2[%c12_50] : memref<14xf32, #tpu.memory_space<smem>>
    %211 = vector.broadcast %210 : f32 to vector<1x128xf32>
    %212 = arith.addf %209, %211 : vector<1x128xf32>
    %213 = arith.negf %212 : vector<1x128xf32>
    %214 = math.exp %213 : vector<1x128xf32>
    %cst_51 = arith.constant 1.000000e+00 : f32
    %215 = vector.broadcast %cst_51 : f32 to vector<1x128xf32>
    %216 = arith.addf %215, %214 : vector<1x128xf32>
    %217 = arith.divf %215, %216 : vector<1x128xf32>
    %cst_52 = arith.constant 5.000000e-01 : f32
    %218 = vector.broadcast %cst_52 : f32 to vector<1x128xf32>
    %219 = arith.subf %217, %218 : vector<1x128xf32>
    %c12_53 = arith.constant 12 : index
    %220 = memref.load %arg3[%c12_53] : memref<14xf32, #tpu.memory_space<smem>>
    %221 = vector.broadcast %220 : f32 to vector<1x128xf32>
    %222 = arith.mulf %221, %219 : vector<1x128xf32>
    %223 = arith.addf %206, %222 : vector<1x128xf32>
    %c13 = arith.constant 13 : index
    %224 = memref.load %arg1[%c13] : memref<14xf32, #tpu.memory_space<smem>>
    %225 = vector.broadcast %224 : f32 to vector<1x128xf32>
    %226 = arith.mulf %225, %0 : vector<1x128xf32>
    %c13_54 = arith.constant 13 : index
    %227 = memref.load %arg2[%c13_54] : memref<14xf32, #tpu.memory_space<smem>>
    %228 = vector.broadcast %227 : f32 to vector<1x128xf32>
    %229 = arith.addf %226, %228 : vector<1x128xf32>
    %230 = arith.negf %229 : vector<1x128xf32>
    %231 = math.exp %230 : vector<1x128xf32>
    %cst_55 = arith.constant 1.000000e+00 : f32
    %232 = vector.broadcast %cst_55 : f32 to vector<1x128xf32>
    %233 = arith.addf %232, %231 : vector<1x128xf32>
    %234 = arith.divf %232, %233 : vector<1x128xf32>
    %cst_56 = arith.constant 5.000000e-01 : f32
    %235 = vector.broadcast %cst_56 : f32 to vector<1x128xf32>
    %236 = arith.subf %234, %235 : vector<1x128xf32>
    %c13_57 = arith.constant 13 : index
    %237 = memref.load %arg3[%c13_57] : memref<14xf32, #tpu.memory_space<smem>>
    %238 = vector.broadcast %237 : f32 to vector<1x128xf32>
    %239 = arith.mulf %238, %236 : vector<1x128xf32>
    %240 = arith.addf %223, %239 : vector<1x128xf32>
    %241 = arith.negf %240 : vector<1x128xf32>
    %242 = math.exp %241 : vector<1x128xf32>
    %cst_58 = arith.constant 1.000000e+00 : f32
    %243 = vector.broadcast %cst_58 : f32 to vector<1x128xf32>
    %244 = arith.addf %243, %242 : vector<1x128xf32>
    %245 = arith.divf %243, %244 : vector<1x128xf32>
    %cst_59 = arith.constant 5.000000e-01 : f32
    %246 = vector.broadcast %cst_59 : f32 to vector<1x128xf32>
    %247 = arith.subf %245, %246 : vector<1x128xf32>
    %c0_60 = arith.constant 0 : index
    %c0_61 = arith.constant 0 : index
    %248 = vector.load %arg6[%c0_60, %c0_61] : memref<1x128xf32, #tpu.memory_space<vmem>>, vector<1x128xf32>
    tpu.vector_store %arg6[%c0_60, %c0_61], %247 {strides = array<i32>} : memref<1x128xf32, #tpu.memory_space<vmem>>, vector<1x128xf32>,
    return
  }
  func.func @transform_0(%arg0: i32) -> i32 {
    %c0_i32 = arith.constant 0 : i32
    %c0_i32_0 = arith.constant 0 : i32
    return %c0_i32 : i32
  }
  func.func @transform_1(%arg0: i32) -> i32 {
    %c0_i32 = arith.constant 0 : i32
    %c0_i32_0 = arith.constant 0 : i32
    return %c0_i32 : i32
  }
  func.func @transform_2(%arg0: i32) -> i32 {
    %c0_i32 = arith.constant 0 : i32
    %c0_i32_0 = arith.constant 0 : i32
    return %c0_i32 : i32
  }
  func.func @transform_3(%arg0: i32) -> i32 {
    %c0_i32 = arith.constant 0 : i32
    %c0_i32_0 = arith.constant 0 : i32
    return %c0_i32 : i32
  }
  func.func @transform_4(%arg0: i32) -> (i32, i32) {
    %c0_i32 = arith.constant 0 : i32
    %c0_i32_0 = arith.constant 0 : i32
    return %arg0, %c0_i32 : i32, i32
  }
  func.func @transform_5(%arg0: i32) -> (i32, i32) {
    %c0_i32 = arith.constant 0 : i32
    %c0_i32_0 = arith.constant 0 : i32
    return %arg0, %c0_i32 : i32, i32
  }
}

</mosaic_0001>

<bundles_post_ra>
// kernel: tpu_custom_call.1
= control target key start
LH: loop header
LB: loop body
LE: loop exit
PB: predicated region body
PF: predicated region fallthrough
CT: control target
= control target key end

     0   :  { %11 = vsyncpa [#allocation5], 0  ;;  %s1105_s0 = inlined_call_operand.vmem [shape: f32[14], index: 0, kind: input, shape index: {}]   ;;  %s1106_s1 = inlined_call_operand.vmem [shape: f32[14], index: 1, kind: input, shape index: {}]   ;;  %s1107_s2 = inlined_call_operand.vmem [shape: f32[14], index: 2, kind: input, shape index: {}]   ;;  %s1108_s3 = inlined_call_operand.<no memory space> [shape: f32[1], index: 3, kind: input, shape index: {}]   ;;  %s1109_s4 = inlined_call_operand.vmem [shape: f32[1,128], index: 4, kind: input, shape index: {}]   ;;  %s1110_s5 = inlined_call_operand.hbm [shape: f32[1,128], index: 5, kind: output, shape index: {}]  }
   0x1   :  { %12 = vsyncpa [#allocation7], 0  ;;  %s28_s20 = sshll.u32 %s1106_s1, 4  ;;  %s29_s20 = int_to_ptr.vmem [resolvable:$true] %s28_s20 }
   0x2   :  { %13 = vsyncpa [#allocation4], 0  ;;  %s19_s23 = sshll.u32 %s1105_s0, 4  ;;  %s719_s24 = smov [#allocation6]   ;;  %s20_s23 = int_to_ptr.vmem [resolvable:$true] %s19_s23 }
   0x3   :  { %31 = dma.vmem_to_smem %s29_s20, 16, %s719_s24, [#allocation7]  }
   0x4   :  { %s720_s25 = smov [#allocation3]   ;;  %s37_s28 = sshll.u32 %s1107_s2, 4  ;;  %s38_s28 = int_to_ptr.vmem [resolvable:$true] %s37_s28 }
   0x5   :  { %22 = dma.vmem_to_smem %s20_s23, 16, %s720_s25, [#allocation5]  }
   0x6   :  { %s721_s29 = smov [#allocation8]  }
   0x7   :  { %40 = dma.vmem_to_smem %s38_s28, 16, %s721_s29, [#allocation7]  }
   0x8   :  { %713 = dma.done.wait [#allocation5], 16  }
   0x9   :  { %714 = vsyncadd [#allocation5], 4294967280 }
   0xa   :  { %715 = dma.done.wait [#allocation7], 32  }
   0xb   :  { %716 = vsyncadd [#allocation7], 4294967264 }
   0xc   :  { %57 = sfence }
   0xd   :  { %s61_s1 = sld [smem:[#allocation3]]  ;;  %v765_v0 = vld [vmem:[%s1109_s4] sm:$0x1]  ;;  %v60_v39 = vstv %s1108_s3  ;;  %s722_s19 = smov [#allocation9]  }
   0xe   :  { %s64_s30 = sld [smem:[#allocation6]]  ;;  %s507_s20 = sshll.u32 %s722_s19, 4  ;;  %s508_s20 = int_to_ptr.vmem [resolvable:$true] %s507_s20 }
   0xf   :  { %s522_s0 = sld [smem:[#allocation3 + $0x1]] }
  0x10   :  { %s523_s8 = sld [smem:[#allocation6 + $0x1]] }
  0x11   :  { %s527_s9 = sld [smem:[#allocation3 + $0x2]] }
  0x12   :  { %s528_s2 = sld [smem:[#allocation6 + $0x2]] }
  0x13   :  { %v62_v1 = vstv %s61_s1  ;;  %s532_s10 = sld [smem:[#allocation3 + $0x3]] }
  0x14   :  { %v63_v2 = vmul.f32 %v62_v1, %v765_v0  ;;  %v65_v3 = vstv %s64_s30  ;;  %s533_s11 = sld [smem:[#allocation6 + $0x3]] }
  0x15   :  { %v92_v5 = vstv %s522_s0  ;;  %s537_s12 = sld [smem:[#allocation3 + $0x4]] }
  0x16   :  { %v66_v4 = vadd.f32 %v65_v3, %v63_v2  ;;  %v93_v6 = vmul.f32 %v92_v5, %v765_v0  ;;  %v95_v7 = vstv %s523_s8  ;;  %s538_s4 = sld [smem:[#allocation6 + $0x4]] }
  0x17   :  { %v122_v10 = vstv %s527_s9  ;;  %s542_s13 = sld [smem:[#allocation3 + $0x5]] }
  0x18   :  { %v520_v8 = vmul.f32 -1.442695, %v66_v4  ;;  %v96_v9 = vadd.f32 %v95_v7, %v93_v6  ;;  %v123_v11 = vmul.f32 %v122_v10, %v765_v0  ;;  %v125_v12 = vstv %s528_s2  ;;  %s543_s14 = sld [smem:[#allocation6 + $0x5]] }
  0x19   :  { %v152_v15 = vstv %s532_s10  ;;  %s547_s15 = sld [smem:[#allocation3 + $0x6]] }
  0x1a   :  { %593 = vpow2.f32 %v520_v8  ;;  %v524_v13 = vmul.f32 -1.442695, %v96_v9  ;;  %v126_v14 = vadd.f32 %v125_v12, %v123_v11  ;;  %v153_v16 = vmul.f32 %v152_v15, %v765_v0  ;;  %s772_s16 = sld [smem:[#allocation6 + $0x6]] }
  0x1b   :  { %v155_v17 = vstv %s533_s11  ;;  %v182_v20 = vstv %s537_s12  ;;  %s774_s17 = sld [smem:[#allocation8]] }
  0x1c   :  { %595 = vpow2.f32 %v524_v13  ;;  %v529_v18 = vmul.f32 -1.442695, %v126_v14  ;;  %v156_v19 = vadd.f32 %v155_v17, %v153_v16  ;;  %v183_v22 = vmul.f32 %v182_v20, %v765_v0  ;;  %s780_s18 = sld [smem:[#allocation3 + $0x7]] }
  0x1d   :  { %v185_v23 = vstv %s538_s4  ;;  %v212_v27 = vstv %s542_s13  ;;  %s801_s21 = sld [smem:[#allocation6 + $0x7]] }
  0x1e   :  { %597 = vpow2.f32 %v529_v18  ;;  %v534_v25 = vmul.f32 -1.442695, %v156_v19  ;;  %v186_v26 = vadd.f32 %v185_v23, %v183_v22  ;;  %v213_v31 = vmul.f32 %v212_v27, %v765_v0  ;;  %s810_s22 = sld [smem:[#allocation8 + $0x1]] }
  0x1f   :  { %v215_v32 = vstv %s543_s14  ;;  %v242_v33 = vstv %s547_s15  ;;  %s822_s23 = sld [smem:[#allocation8 + $0x2]] }
  0x20   :  { %v594_v21 = vpop.eup %593  ;;  %v539_v30 = vmul.f32 -1.442695, %v186_v26  ;;  %v216_v38 = vadd.f32 %v215_v32, %v213_v31  ;;  %v243_v40 = vmul.f32 %v242_v33, %v765_v0  ;;  %v245_v41 = vstv %s772_s16  ;;  %s846_s24 = sld [smem:[#allocation8 + $0x3]] }
  0x21   :  { %v70_v24 = vadd.f32 1.0, %v594_v21  ;;  %v88_v43 = vstv %s774_s17  ;;  %s858_s25 = sld [smem:[#allocation8 + $0x4]] }
  0x22   :  { %v596_v28 = vpop.eup %595  ;;  %v544_v48 = vmul.f32 -1.442695, %v216_v38  ;;  %v246_v49 = vadd.f32 %v245_v41, %v243_v40  ;;  %v272_v63 = vstv %s780_s18  ;;  %s869_s26 = sld [smem:[#allocation3 + $0x8]] }
  0x23   :  { %599 = vrcp.f32 %v70_v24  ;;  %v776_v29 = vadd.f32 1.0, %v596_v28  ;;  %v80_v35 = vand.u32 2147483647, %v70_v24  ;;  %v82_v36 = vand.u32 2147483648, %v70_v24  ;;  %s890_s27 = sld [smem:[#allocation6 + $0x8]] }
  0x24   :  { %601 = vpow2.f32 %v534_v25  ;;  %v598_v34 = vpop.eup %597  ;;  %vm76_vm0 = vweird.f32 %v70_v24  ;;  %v549_v62 = vmul.f32 -1.442695, %v246_v49  ;;  %v273_v10 = vmul.f32 %v272_v63, %v765_v0  ;;  %s897_s1 = sld [smem:[#allocation3 + $0x9]] }
  0x25   :  { %603 = vrcp.f32 %v776_v29  ;;  %v782_v37 = vadd.f32 1.0, %v598_v34  ;;  %v110_v44 = vand.u32 2147483647, %v776_v29  ;;  %vm792_vm1 = vcmp.eq.f32.partialorder %v80_v35, 8.507059e+37  ;;  %s903_s30 = sld [smem:[#allocation6 + $0x9]] }
  0x26   :  { %605 = vpow2.f32 %v539_v30  ;;  %v83_v50 = vor.u32 1.1754944e-38, %v82_v36  ;;  %v112_v51 = vand.u32 2147483648, %v776_v29  ;;  %vm106_vm3 = vweird.f32 %v776_v29  ;;  %s911_s3 = sld [smem:[#allocation3 + $0xa]] }
  0x27   :  { %607 = vrcp.f32 %v782_v37  ;;  %v140_v52 = vand.u32 2147483647, %v782_v37  ;;  %v142_v56 = vand.u32 2147483648, %v782_v37  ;;  %vm805_vm4 = vcmp.eq.f32.partialorder %v110_v44, 8.507059e+37  ;;  %s927_s0 = sld [smem:[#allocation6 + $0xa]] }
  0x28   :  { %609 = vpow2.f32 %v544_v48  ;;  %v113_v4 = vor.u32 1.1754944e-38, %v112_v51  ;;  %vm136_vm7 = vweird.f32 %v782_v37  ;;  %v275_v23 = vstv %s801_s21  ;;  %s939_s6 = sld [smem:[#allocation3 + $0xb]] }
  0x29   :  { %v600_v42 = vpop.eup %599  ;;  %vm825_vm8 = vcmp.eq.f32.partialorder %v140_v52, 8.507059e+37  ;;  %v143_v8 = vor.u32 1.1754944e-38, %v142_v56  ;;  %v118_v33 = vstv %s810_s22  ;;  %v148_v34 = vstv %s822_s23  ;;  %s943_s7 = sld [smem:[#allocation6 + $0xb]]  ;;  %s509_s23 = sshll.u32 %s1110_s5, 4  ;;  %s510_s23 = int_to_ptr.hbm [resolvable:$true] %s509_s23 }
  0x2a   :  { %v602_v45 = vpop.eup %601  ;;  %v72_v46 = vmul.f32 %v600_v42, %v70_v24  ;;  %vm77_vm2 = vweird.f32 %v600_v42  ;;  %v276_v35 = vadd.f32 %v275_v23, %v273_v10  ;;  %v305_v10 = vstv %s890_s27  ;;  %s949_s8 = sld [smem:[#allocation3 + $0xc]] }
  0x2b   :  { %v798_v53 = vadd.f32 1.0, %v602_v45  ;;  %v604_v54 = vpop.eup %603  ;;  %vm817_vm5 = vmor %vm76_vm0, %vm77_vm2  ;;  %s959_s9 = sld [smem:[#allocation8 + $0x5]] }
  0x2c   :  { %v73_v55 = vsub.f32 1.0, %v72_v46  ;;  %v606_v57 = vpop.eup %605  ;;  %v102_v58 = vmul.f32 %v604_v54, %v776_v29  ;;  %vm107_vm6 = vweird.f32 %v604_v54  ;;  %s965_s2 = sld [smem:[#allocation6 + $0xc]] }
  0x2d   :  { %611 = vrcp.f32 %v798_v53  ;;  %v812_v61 = vadd.f32 1.0, %v606_v57  ;;  %v608_v1 = vpop.eup %607  ;;  %vm166_vm9 = vweird.f32 %v798_v53  ;;  %vm836_vm10 = vmor %vm106_vm3, %vm107_vm6  ;;  %v170_v18 = vand.u32 2147483647, %v798_v53  ;;  %s983_s10 = sld [smem:[#allocation3 + $0xd]] }
  0x2e   :  { %v74_v60 = vmul.f32 %v600_v42, %v73_v55  ;;  %v103_v3 = vsub.f32 1.0, %v102_v58  ;;  %v132_v6 = vmul.f32 %v608_v1, %v782_v37  ;;  %v610_v11 = vpop.eup %609  ;;  %vm137_vm11 = vweird.f32 %v608_v1  ;;  %s988_s11 = sld [smem:[#allocation8 + $0x6]] }
  0x2f   :  { %613 = vrcp.f32 %v812_v61  ;;  %v843_v19 = vadd.f32 1.0, %v610_v11  ;;  %vm853_vm12 = vmor %vm136_vm7, %vm137_vm11  ;;  %v172_v26 = vand.u32 2147483648, %v798_v53  ;;  %vm873_vm14 = vcmp.eq.f32.partialorder %v170_v18, 8.507059e+37  ;;  %s997_s12 = sld [smem:[#allocation6 + $0xd]] }
  0x30   :  { %v75_v5 = vadd.f32 %v600_v42, %v74_v60  ;;  %v104_v9 = vmul.f32 %v604_v54, %v103_v3  ;;  %v133_v14 = vsub.f32 1.0, %v132_v6  ;;  %615 = vpow2.f32 %v549_v62  ;;  %s1005_s4 = sld [smem:[#allocation8 + $0x7]] }
  0x31   :  { %617 = vrcp.f32 %v843_v19  ;;  %v173_v44 = vor.u32 1.1754944e-38, %v172_v26  ;;  %vm196_vm0 = vweird.f32 %v812_v61  ;;  %v202_v45 = vand.u32 2147483648, %v812_v61  ;;  %s1025_s13 = sld [smem:[#allocation8 + $0x8]] }
  0x32   :  { %v79_v12 = vsel %vm817_vm5, %v600_v42, %v75_v5  ;;  %v105_v17 = vadd.f32 %v604_v54, %v104_v9  ;;  %v134_v21 = vmul.f32 %v608_v1, %v133_v14  ;;  %v200_v55 = vand.u32 2147483647, %v812_v61  ;;  %s1044_s14 = sld [smem:[#allocation8 + $0x9]] }
  0x33   :  { %v612_v15 = vpop.eup %611  ;;  %v84_v16 = vsel %vm792_vm1, %v83_v50, %v79_v12  ;;  %v178_v57 = vstv %s846_s24  ;;  %v203_v59 = vor.u32 1.1754944e-38, %v202_v45  ;;  %v208_v60 = vstv %s858_s25  ;;  %s1071_s15 = sld [smem:[#allocation8 + $0xa]] }
  0x34   :  { %v521_v20 = vadd.f32 -0.5, %v84_v16  ;;  %v162_v22 = vmul.f32 %v612_v15, %v798_v53  ;;  %v109_v24 = vsel %vm836_vm10, %v604_v54, %v105_v17  ;;  %vm167_vm13 = vweird.f32 %v612_v15  ;;  %s1092_s16 = sld [smem:[#allocation8 + $0xb]] }
  0x35   :  { %v114_v28 = vsel %vm805_vm4, %v113_v4, %v109_v24  ;;  %v135_v29 = vadd.f32 %v608_v1, %v134_v21  ;;  %v865_v31 = vpop.eup %613  ;;  %vm884_vm15 = vmor %vm166_vm9, %vm167_vm13  ;;  %v554_v53 = vmul.f32 -1.442695, %v276_v35  ;;  %v232_v2 = vand.u32 2147483648, %v843_v19  ;;  %s581_s17 = sld [smem:[#allocation8 + $0xc]] }
  0x36   :  { %v89_v27 = vmul.f32 %v521_v20, %v88_v43  ;;  %v163_v30 = vsub.f32 1.0, %v162_v22  ;;  %v525_v32 = vadd.f32 -0.5, %v114_v28  ;;  %v616_v36 = vpop.eup %615  ;;  %v192_v41 = vmul.f32 %v865_v31, %v812_v61  ;;  %s586_s18 = sld [smem:[#allocation8 + $0xd]] }
  0x37   :  { %v139_v37 = vsel %vm853_vm12, %v608_v1, %v135_v29  ;;  %vm197_vm1 = vweird.f32 %v865_v31  ;;  %v899_v49 = vpop.eup %617  ;;  %v901_v52 = vadd.f32 1.0, %v616_v36  ;;  %v302_v61 = vstv %s869_s26 }
  0x38   :  { %v164_v38 = vmul.f32 %v612_v15, %v163_v30  ;;  %v144_v42 = vsel %vm825_vm8, %v143_v8, %v139_v37  ;;  %v90_v46 = vadd.f32 %v89_v27, %v60_v39  ;;  %v193_v48 = vsub.f32 1.0, %v192_v41  ;;  %vm916_vm2 = vmor %vm196_vm0, %vm197_vm1 }
  0x39   :  { %v119_v50 = vmul.f32 %v525_v32, %v118_v33  ;;  %v530_v51 = vadd.f32 -0.5, %v144_v42  ;;  %v222_v56 = vmul.f32 %v899_v49, %v843_v19  ;;  %619 = vrcp.f32 %v901_v52 }
  0x3a   :  { %v165_v47 = vadd.f32 %v612_v15, %v164_v38  ;;  %v194_v54 = vmul.f32 %v865_v31, %v193_v48  ;;  %621 = vpow2.f32 %v554_v53  ;;  %vm201_vm3 = vcmp.eq.f32.partialorder %v200_v55, 8.507059e+37 }
  0x3b   :  { %v223_v1 = vsub.f32 1.0, %v222_v56  ;;  %v120_v3 = vadd.f32 %v119_v50, %v90_v46  ;;  %v149_v4 = vmul.f32 %v530_v51, %v148_v34  ;;  %v303_v7 = vmul.f32 %v302_v61, %v765_v0 }
  0x3c   :  { %v169_v39 = vsel %vm884_vm15, %v612_v15, %v165_v47  ;;  %v195_v63 = vadd.f32 %v865_v31, %v194_v54  ;;  %vm226_vm4 = vweird.f32 %v843_v19  ;;  %v230_v9 = vand.u32 2147483647, %v843_v19 }
  0x3d   :  { %v174_v62 = vsel %vm873_vm14, %v173_v44, %v169_v39  ;;  %v224_v6 = vmul.f32 %v899_v49, %v223_v1  ;;  %vm227_vm5 = vweird.f32 %v899_v49  ;;  %v233_v11 = vor.u32 1.1754944e-38, %v232_v2 }
  0x3e   :  { %v199_v5 = vsel %vm916_vm2, %v865_v31, %v195_v63  ;;  %v535_v8 = vadd.f32 -0.5, %v174_v62  ;;  %vm256_vm6 = vweird.f32 %v901_v52  ;;  %v306_v12 = vadd.f32 %v305_v10, %v303_v7  ;;  %vm955_vm7 = vmor %vm226_vm4, %vm227_vm5 }
  0x3f   :  { %v620_v13 = vpop.eup %619  ;;  %v150_v14 = vadd.f32 %v149_v4, %v120_v3  ;;  %v204_v15 = vsel %vm201_vm3, %v203_v59, %v199_v5  ;;  %v260_v16 = vand.u32 2147483647, %v901_v52  ;;  %v332_v17 = vstv %s897_s1 }
  0x40   :  { %v225_v18 = vadd.f32 %v899_v49, %v224_v6  ;;  %v252_v20 = vmul.f32 %v620_v13, %v901_v52  ;;  %v335_v21 = vstv %s903_s30  ;;  %v362_v22 = vstv %s911_s3  ;;  %v622_v23 = vpop.eup %621 }
  0x41   :  { %v179_v24 = vmul.f32 %v535_v8, %v178_v57  ;;  %v262_v26 = vand.u32 2147483648, %v901_v52  ;;  %v559_v27 = vmul.f32 -1.442695, %v306_v12  ;;  %v333_v28 = vmul.f32 %v332_v17, %v765_v0 }
  0x42   :  { %v540_v29 = vadd.f32 -0.5, %v204_v15  ;;  %v253_v30 = vsub.f32 1.0, %v252_v20  ;;  %vm257_vm8 = vweird.f32 %v620_v13  ;;  %v963_v31 = vadd.f32 1.0, %v622_v23 }
  0x43   :  { %623 = vpow2.f32 %v559_v27  ;;  %v336_v19 = vadd.f32 %v335_v21, %v333_v28  ;;  %v363_v32 = vmul.f32 %v362_v22, %v765_v0  ;;  %v365_v33 = vstv %s927_s0  ;;  %vm975_vm10 = vmor %vm256_vm6, %vm257_vm8 }
  0x44   :  { %v229_v34 = vsel %vm955_vm7, %v899_v49, %v225_v18  ;;  %vm231_vm9 = vcmp.eq.f32.partialorder %v230_v9, 8.507059e+37  ;;  %v254_v35 = vmul.f32 %v620_v13, %v253_v30  ;;  %625 = vrcp.f32 %v963_v31 }
  0x45   :  { %vm979_vm11 = vcmp.eq.f32.partialorder %v260_v16, 8.507059e+37  ;;  %v564_v38 = vmul.f32 -1.442695, %v336_v19  ;;  %v366_v40 = vadd.f32 %v365_v33, %v363_v32  ;;  %v180_v41 = vadd.f32 %v179_v24, %v150_v14 }
  0x46   :  { %v255_v42 = vadd.f32 %v620_v13, %v254_v35  ;;  %v263_v43 = vor.u32 1.1754944e-38, %v262_v26  ;;  %v392_v44 = vstv %s939_s6  ;;  %v209_v45 = vmul.f32 %v540_v29, %v208_v60 }
  0x47   :  { %v234_v46 = vsel %vm231_vm9, %v233_v11, %v229_v34  ;;  %627 = vpow2.f32 %v564_v38  ;;  %v569_v47 = vmul.f32 -1.442695, %v366_v40  ;;  %v393_v49 = vmul.f32 %v392_v44, %v765_v0 }
  0x48   :  { %v259_v48 = vsel %vm975_vm10, %v620_v13, %v255_v42  ;;  %v395_v50 = vstv %s943_s7  ;;  %v422_v51 = vstv %s949_s8  ;;  %v238_v53 = vstv %s959_s9 }
  0x49   :  { %v624_v52 = vpop.eup %623  ;;  %629 = vpow2.f32 %v569_v47  ;;  %v423_v39 = vmul.f32 %v422_v51, %v765_v0  ;;  %v545_v55 = vadd.f32 -0.5, %v234_v46  ;;  %v396_v57 = vadd.f32 %v395_v50, %v393_v49 }
  0x4a   :  { %v626_v54 = vpop.eup %625  ;;  %v310_v56 = vadd.f32 1.0, %v624_v52  ;;  %v425_v58 = vstv %s965_s2  ;;  %v210_v59 = vadd.f32 %v209_v45, %v180_v41  ;;  %v264_v60 = vsel %vm979_vm11, %v263_v43, %v259_v48 }
  0x4b   :  { %v282_v62 = vmul.f32 %v626_v54, %v963_v31  ;;  %v426_v63 = vadd.f32 %v425_v58, %v423_v39  ;;  %vm286_vm12 = vweird.f32 %v963_v31  ;;  %vm287_vm13 = vweird.f32 %v626_v54 }
  0x4c   :  { %v292_v1 = vand.u32 2147483648, %v963_v31  ;;  %631 = vrcp.f32 %v310_v56  ;;  %v574_v4 = vmul.f32 -1.442695, %v396_v57  ;;  %v452_v5 = vstv %s983_s10  ;;  %vm1013_vm14 = vmor %vm286_vm12, %vm287_vm13 }
  0x4d   :  { %v628_v2 = vpop.eup %627  ;;  %v283_v3 = vsub.f32 1.0, %v282_v62  ;;  %v579_v61 = vmul.f32 -1.442695, %v426_v63  ;;  %v239_v6 = vmul.f32 %v545_v55, %v238_v53  ;;  %v550_v7 = vadd.f32 -0.5, %v264_v60 }
  0x4e   :  { %v290_v8 = vand.u32 2147483647, %v963_v31  ;;  %v340_v9 = vadd.f32 1.0, %v628_v2  ;;  %v268_v11 = vstv %s988_s11  ;;  %633 = vpow2.f32 %v574_v4 }
  0x4f   :  { %v630_v10 = vpop.eup %629  ;;  %v284_v12 = vmul.f32 %v626_v54, %v283_v3  ;;  %v293_v14 = vor.u32 1.1754944e-38, %v292_v1  ;;  %v453_v15 = vmul.f32 %v452_v5, %v765_v0  ;;  %v455_v18 = vstv %s997_s12 }
  0x50   :  { %635 = vrcp.f32 %v340_v9  ;;  %v1018_v17 = vadd.f32 1.0, %v630_v10  ;;  %v240_v21 = vadd.f32 %v239_v6, %v210_v59  ;;  %v269_v22 = vmul.f32 %v550_v7, %v268_v11 }
  0x51   :  { %v285_v16 = vadd.f32 %v626_v54, %v284_v12  ;;  %637 = vpow2.f32 %v579_v61  ;;  %vm291_vm15 = vcmp.eq.f32.partialorder %v290_v8, 8.507059e+37  ;;  %v320_v23 = vand.u32 2147483647, %v310_v56 }
  0x52   :  { %v632_v20 = vpop.eup %631  ;;  %v322_v26 = vand.u32 2147483648, %v310_v56  ;;  %639 = vrcp.f32 %v1018_v17  ;;  %v298_v27 = vstv %s1005_s4  ;;  %v456_v28 = vadd.f32 %v455_v18, %v453_v15 }
  0x53   :  { %v289_v24 = vsel %vm1013_vm14, %v626_v54, %v285_v16  ;;  %v312_v25 = vmul.f32 %v632_v20, %v310_v56  ;;  %vm316_vm0 = vweird.f32 %v310_v56  ;;  %vm317_vm1 = vweird.f32 %v632_v20 }
  0x54   :  { %v634_v0 = vpop.eup %633  ;;  %v294_v29 = vsel %vm291_vm15, %v293_v14, %v289_v24  ;;  %v270_v19 = vadd.f32 %v269_v22, %v240_v21  ;;  %v350_v32 = vand.u32 2147483647, %v340_v9  ;;  %v352_v33 = vand.u32 2147483648, %v340_v9  ;;  %vm1033_vm3 = vmor %vm316_vm0, %vm317_vm1 }
  0x55   :  { %v313_v30 = vsub.f32 1.0, %v312_v25  ;;  %v1027_v34 = vadd.f32 1.0, %v634_v0  ;;  %vm1029_vm2 = vcmp.eq.f32.partialorder %v320_v23, 8.507059e+37  ;;  %v323_v38 = vor.u32 1.1754944e-38, %v322_v26 }
  0x56   :  { %v636_v31 = vpop.eup %635  ;;  %v555_v41 = vadd.f32 -0.5, %v294_v29  ;;  %vm346_vm4 = vweird.f32 %v340_v9  ;;  %v584_v43 = vmul.f32 -1.442695, %v456_v28  ;;  %vm1040_vm6 = vcmp.eq.f32.partialorder %v350_v32, 8.507059e+37 }
  0x57   :  { %v638_v35 = vpop.eup %637  ;;  %v314_v36 = vmul.f32 %v632_v20, %v313_v30  ;;  %v342_v40 = vmul.f32 %v636_v31, %v340_v9  ;;  %641 = vrcp.f32 %v1027_v34  ;;  %vm347_vm5 = vweird.f32 %v636_v31 }
  0x58   :  { %v640_v44 = vpop.eup %639  ;;  %v1038_v47 = vadd.f32 1.0, %v638_v35  ;;  %v353_v49 = vor.u32 1.1754944e-38, %v352_v33  ;;  %v380_v51 = vand.u32 2147483647, %v1018_v17  ;;  %v382_v39 = vand.u32 2147483648, %v1018_v17  ;;  %vm1055_vm7 = vmor %vm346_vm4, %vm347_vm5 }
  0x59   :  { %v315_v45 = vadd.f32 %v632_v20, %v314_v36  ;;  %v343_v46 = vsub.f32 1.0, %v342_v40  ;;  %v372_v50 = vmul.f32 %v640_v44, %v1018_v17  ;;  %vm376_vm8 = vweird.f32 %v1018_v17 }
  0x5a   :  { %643 = vrcp.f32 %v1038_v47  ;;  %vm377_vm9 = vweird.f32 %v640_v44  ;;  %v299_v57 = vmul.f32 %v555_v41, %v298_v27  ;;  %v328_v62 = vstv %s1025_s13 }
  0x5b   :  { %v319_v52 = vsel %vm1033_vm3, %v632_v20, %v315_v45  ;;  %v344_v53 = vmul.f32 %v636_v31, %v343_v46  ;;  %v373_v56 = vsub.f32 1.0, %v372_v50  ;;  %645 = vpow2.f32 %v584_v43  ;;  %vm1067_vm11 = vmor %vm376_vm8, %vm377_vm9 }
  0x5c   :  { %v324_v54 = vsel %vm1029_vm2, %v323_v38, %v319_v52  ;;  %vm1061_vm10 = vcmp.eq.f32.partialorder %v380_v51, 8.507059e+37  ;;  %v383_v4 = vor.u32 1.1754944e-38, %v382_v39  ;;  %v412_v5 = vand.u32 2147483648, %v1027_v34 }
  0x5d   :  { %v560_v58 = vadd.f32 -0.5, %v324_v54  ;;  %v345_v59 = vadd.f32 %v636_v31, %v344_v53  ;;  %v642_v60 = vpop.eup %641  ;;  %v374_v63 = vmul.f32 %v640_v44, %v373_v56  ;;  %vm406_vm12 = vweird.f32 %v1027_v34 }
  0x5e   :  { %v402_v61 = vmul.f32 %v642_v60, %v1027_v34  ;;  %v410_v8 = vand.u32 2147483647, %v1027_v34  ;;  %v300_v10 = vadd.f32 %v299_v57, %v270_v19  ;;  %vm407_vm13 = vweird.f32 %v642_v60 }
  0x5f   :  { %v349_v2 = vsel %vm1055_vm7, %v636_v31, %v345_v59  ;;  %v375_v7 = vadd.f32 %v640_v44, %v374_v63  ;;  %v329_v11 = vmul.f32 %v560_v58, %v328_v62  ;;  %v358_v14 = vstv %s1044_s14  ;;  %vm1088_vm15 = vmor %vm406_vm12, %vm407_vm13 }
  0x60   :  { %v354_v6 = vsel %vm1040_vm6, %v353_v49, %v349_v2  ;;  %v644_v9 = vpop.eup %643  ;;  %v403_v12 = vsub.f32 1.0, %v402_v61  ;;  %v413_v21 = vor.u32 1.1754944e-38, %v412_v5  ;;  %vm436_vm14 = vweird.f32 %v1038_v47 }
  0x61   :  { %v565_v13 = vadd.f32 -0.5, %v354_v6  ;;  %v379_v15 = vsel %vm1067_vm11, %v640_v44, %v375_v7  ;;  %v432_v16 = vmul.f32 %v644_v9, %v1038_v47  ;;  %v646_v17 = vpop.eup %645  ;;  %vm437_vm0 = vweird.f32 %v644_v9 }
  0x62   :  { %v384_v18 = vsel %vm1061_vm10, %v383_v4, %v379_v15  ;;  %v404_v20 = vmul.f32 %v642_v60, %v403_v12  ;;  %v442_v24 = vand.u32 2147483648, %v1038_v47  ;;  %v460_v25 = vadd.f32 1.0, %v646_v17  ;;  %vm438_vm2 = vmor %vm436_vm14, %vm437_vm0 }
  0x63   :  { %v433_v23 = vsub.f32 1.0, %v432_v16  ;;  %v330_v26 = vadd.f32 %v329_v11, %v300_v10  ;;  %vm411_vm1 = vcmp.eq.f32.partialorder %v410_v8, 8.507059e+37  ;;  %v440_v28 = vand.u32 2147483647, %v1038_v47 }
  0x64   :  { %v405_v27 = vadd.f32 %v642_v60, %v404_v20  ;;  %v359_v0 = vmul.f32 %v565_v13, %v358_v14  ;;  %v570_v29 = vadd.f32 -0.5, %v384_v18  ;;  %647 = vrcp.f32 %v460_v25 }
  0x65   :  { %v434_v30 = vmul.f32 %v644_v9, %v433_v23  ;;  %v388_v31 = vstv %s1071_s15  ;;  %v443_v34 = vor.u32 1.1754944e-38, %v442_v24  ;;  %vm441_vm3 = vcmp.eq.f32.partialorder %v440_v28, 8.507059e+37 }
  0x66   :  { %v409_v19 = vsel %vm1088_vm15, %v642_v60, %v405_v27  ;;  %v360_v35 = vadd.f32 %v359_v0, %v330_v26  ;;  %v389_v36 = vmul.f32 %v570_v29, %v388_v31  ;;  %v418_v41 = vstv %s1092_s16 }
  0x67   :  { %v414_v32 = vsel %vm411_vm1, %v413_v21, %v409_v19  ;;  %v435_v33 = vadd.f32 %v644_v9, %v434_v30  ;;  %vm466_vm4 = vweird.f32 %v460_v25  ;;  %v470_v45 = vand.u32 2147483647, %v460_v25 }
  0x68   :  { %v575_v38 = vadd.f32 -0.5, %v414_v32  ;;  %v390_v44 = vadd.f32 %v389_v36, %v360_v35  ;;  %v472_v46 = vand.u32 2147483648, %v460_v25  ;;  %v448_v50 = vstv %s581_s17 }
  0x69   :  { %v439_v37 = vsel %vm438_vm2, %v644_v9, %v435_v33  ;;  %vm471_vm7 = vcmp.eq.f32.partialorder %v470_v45, 8.507059e+37  ;;  %v478_v57 = vstv %s586_s18 }
  0x6a   :  { %v648_v40 = vpop.eup %647  ;;  %v444_v42 = vsel %vm441_vm3, %v443_v34, %v439_v37  ;;  %v419_v47 = vmul.f32 %v575_v38, %v418_v41  ;;  %v473_v52 = vor.u32 1.1754944e-38, %v472_v46 }
  0x6b   :  { %v462_v43 = vmul.f32 %v648_v40, %v460_v25  ;;  %v580_v48 = vadd.f32 -0.5, %v444_v42  ;;  %vm467_vm5 = vweird.f32 %v648_v40 }
  0x6c   :  { %vm468_vm6 = vmor %vm466_vm4, %vm467_vm5  ;;  %v420_v53 = vadd.f32 %v419_v47, %v390_v44 }
  0x6d   :  { %v463_v49 = vsub.f32 1.0, %v462_v43  ;;  %v449_v39 = vmul.f32 %v580_v48, %v448_v50 }
  0x6f   :  { %v464_v51 = vmul.f32 %v648_v40, %v463_v49  ;;  %v450_v58 = vadd.f32 %v449_v39, %v420_v53 }
  0x71   :  { %v465_v54 = vadd.f32 %v648_v40, %v464_v51 }
  0x73   :  { %v469_v55 = vsel %vm468_vm6, %v648_v40, %v465_v54 }
  0x74   :  { %v474_v56 = vsel %vm471_vm7, %v473_v52, %v469_v55 }
  0x75   :  { %v585_v59 = vadd.f32 -0.5, %v474_v56 }
  0x77   :  { %v479_v60 = vmul.f32 %v585_v59, %v478_v57 }
  0x79   :  { %v480_v62 = vadd.f32 %v479_v60, %v450_v58 }
  0x7b   :  { %v587_v63 = vmul.f32 -1.442695, %v480_v62 }
  0x7d   :  { %649 = vpow2.f32 %v587_v63 }
  0x83   :  { %v650_v1 = vpop.eup %649 }
  0x84   :  { %v484_v2 = vadd.f32 1.0, %v650_v1 }
  0x86   :  { %651 = vrcp.f32 %v484_v2  ;;  %v496_v61 = vand.u32 2147483648, %v484_v2  ;;  %vm490_vm8 = vweird.f32 %v484_v2  ;;  %v494_v6 = vand.u32 2147483647, %v484_v2 }
  0x88   :  { %v497_v8 = vor.u32 1.1754944e-38, %v496_v61  ;;  %vm495_vm11 = vcmp.eq.f32.partialorder %v494_v6, 8.507059e+37 }
  0x8c   :  { %v652_v3 = vpop.eup %651 }
  0x8d   :  { %v486_v4 = vmul.f32 %v652_v3, %v484_v2  ;;  %vm491_vm9 = vweird.f32 %v652_v3 }
  0x8e   :  { %vm492_vm10 = vmor %vm490_vm8, %vm491_vm9 }
  0x8f   :  { %v487_v5 = vsub.f32 1.0, %v486_v4 }
  0x91   :  { %v488_v7 = vmul.f32 %v652_v3, %v487_v5 }
  0x93   :  { %v489_v9 = vadd.f32 %v652_v3, %v488_v7 }
  0x95   :  { %v493_v10 = vsel %vm492_vm10, %v652_v3, %v489_v9 }
  0x96   :  { %v498_v11 = vsel %vm495_vm11, %v497_v8, %v493_v10 }
  0x97   :  { %v588_v12 = vadd.f32 -0.5, %v498_v11 }
  0x99   :  { %501 = vst [vmem:[#allocation9] sm:$0x1] %v588_v12 }
  0x9a   :  { %512 = dma.vmem_to_hbm [thread:$0]  %s508_s20, 16, %s510_s23, [#allocation4]  }
  0x9b   :  { %717 = dma.done.wait [#allocation4], 16  }
  0x9c   :  { %718 = vsyncadd [#allocation4], 4294967280 }
  0x9d   :  { %517 = vsyncpa [#allocation4], 1 }
  0x9e   :  { %518 = vsyncpa [#allocation5], 1 }
  0x9f   :  { %519 = vsyncpa [#allocation7], 1 }

</bundles_post_ra>
